<compile_context>
chip_gen: v7x
topology: tpu7x:2x2x1
jax: 0.10.0
libtpu: 0.0.40
codegen_flags: <defaults>
</compile_context>

<pallas_src>
import math

import jax
import jax.numpy as jnp
from jax import lax
from jax.experimental import pallas as pl
from jax.experimental.pallas import tpu as pltpu


def _round_up(x, m):
    return ((x + m - 1) // m) * m


def _logreg_kernel(x_ref, w_ref, b_ref, o_ref):
    # x_ref: (TN, F) VMEM tile (native dtype), streamed / double-buffered per grid step
    # w_ref: (1, F)  VMEM, constant index_map -> stays resident across grid steps
    # b_ref: (1, 1)  SMEM scalar (f32)
    # o_ref: (1, TN) VMEM lane-dense output row (f32)
    #
    # MXU dot: contract F of w with F of x -> (1, TN) lane-dense logits, f32 accum.
    # This keeps the XLU idle (no lane reduce, no relayout) and uses the otherwise
    # empty vector-extended slot; compute is negligible next to the x DMA anyway.
    logits = lax.dot_general(
        w_ref[...], x_ref[...],
        dimension_numbers=(((1,), (1,)), ((), ())),
        preferred_element_type=jnp.float32,
        precision=lax.Precision.HIGHEST,
    )                                                # (1, TN) f32
    logits = logits + b_ref[0, 0]                    # scalar bias from SMEM
    # Exact sigmoid on the EUP (exp + exact reciprocal); exp(-z)->inf gives 0 correctly.
    o_ref[...] = (1.0 / (1.0 + jnp.exp(-logits))).astype(o_ref.dtype)


def _logreg_tiles(x, w_row, b2, tn):
    """Run the kernel over x (M, F) with M % tn == 0. Returns (1, M) f32 probs."""
    m, f = x.shape
    num_tiles = m // tn
    itemsize = x.dtype.itemsize

    cost = pl.CostEstimate(
        flops=2 * m * f,
        transcendentals=m,
        bytes_accessed=m * f * itemsize + m * 4 + f * itemsize,
    )
    # Double-buffered x tile + double-buffered (1, tn) f32 output + resident weight.
    vmem_need = 2 * tn * f * itemsize + 2 * tn * 4 + 2 * f * 4 + (1 << 20)
    vmem_limit = int(max(vmem_need, 32 << 20))

    return pl.pallas_call(
        _logreg_kernel,
        out_shape=jax.ShapeDtypeStruct((1, m), jnp.float32),
        grid_spec=pl.GridSpec(
            grid=(num_tiles,),
            in_specs=[
                pl.BlockSpec((tn, f), lambda i: (i, 0)),            # streamed row tiles
                pl.BlockSpec((1, f), lambda i: (0, 0)),             # weight stays resident
                pl.BlockSpec(memory_space=pltpu.MemorySpace.SMEM),  # bias scalar in SMEM
            ],
            out_specs=pl.BlockSpec((1, tn), lambda i: (0, i)),      # lane-dense output row
        ),
        compiler_params=pltpu.CompilerParams(
            dimension_semantics=("parallel",),   # independent row tiles (v7x 2-TC split)
            vmem_limit_bytes=vmem_limit,
        ),
        cost_estimate=cost,
    )(x, w_row, b2)


def logistic_regression(x, weight, bias, *, block_rows=32768):
    """y = sigmoid(x @ weight.T + bias)

    x:      (N, F)  float32 or bfloat16 (consumed in its native dtype; f32 accumulation)
    weight: (1, F)  (PyTorch nn.Linear layout)
    bias:   (1,)
    returns (N, 1)  float32
    """
    n, f = x.shape
    assert block_rows % 128 == 0, "block_rows must be a multiple of 128"

    w_row = weight.reshape(1, f).astype(x.dtype)      # MXU ingests x's dtype, f32 accum
    b2 = bias.reshape(1, 1).astype(jnp.float32)

    if n <= block_rows:
        # Single tile: pad only to the 8-row sublane boundary (<= 7 extra rows).
        tn = _round_up(n, 8)
        xp = jnp.pad(x, ((0, tn - n), (0, 0))) if tn != n else x
        out = _logreg_tiles(xp, w_row, b2, tn)        # (1, tn)
        return out[0, :n].reshape(n, 1)

    # Large N: main grid over the full tiles WITHOUT a full-array pad/copy, and a
    # tiny second call for the remainder rows.
    tn = block_rows
    n_main = (n // tn) * tn
    outs = [_logreg_tiles(x[:n_main], w_row, b2, tn)]              # (1, n_main)
    rem = n - n_main
    if rem:
        t_rows = _round_up(rem, 8)
        x_tail = x[n_main:]
        if t_rows != rem:
            x_tail = jnp.pad(x_tail, ((0, t_rows - rem), (0, 0)))  # <= 7 pad rows
        outs.append(_logreg_tiles(x_tail, w_row, b2, t_rows)[:, :rem])
    out = jnp.concatenate(outs, axis=1)                            # (1, n)
    return out.reshape(n, 1)


if __name__ == "__main__":
    # Breast-cancer-style shapes: 30 input features, small dataloader batch.
    # TODO(synk): dataset loading / StandardScaler / DataLoader are host-side and
    # have no Pallas equivalent; only the LogisticRegression forward is a kernel.
    in_features = 30
    batch = 8

    key = jax.random.PRNGKey(0)
    kx, kw, kb, kx2 = jax.random.split(key, 4)

    x = jax.random.normal(kx, (batch, in_features), dtype=jnp.float32)

    # Deterministic nn.Linear-style init: U(-1/sqrt(F), 1/sqrt(F))
    bound = 1.0 / math.sqrt(in_features)
    weight = jax.random.uniform(
        kw, (1, in_features), minval=-bound, maxval=bound, dtype=jnp.float32
    )
    bias = jax.random.uniform(
        kb, (1,), minval=-bound, maxval=bound, dtype=jnp.float32
    )

    def ref_fn(xx):
        logits = jnp.dot(xx, weight.T, precision=lax.Precision.HIGHEST) + bias
        return jax.nn.sigmoid(logits)

    y = logistic_regression(x, weight, bias)
    jax.block_until_ready(y)
    assert y.shape == (batch, 1)
    err = float(jnp.max(jnp.abs(y - ref_fn(x))))
    assert jnp.allclose(y, ref_fn(x), atol=1e-5, rtol=1e-5), err

    # Exercise the multi-tile path + separate tail call (grid > 1, no full-array pad).
    x_big = jax.random.normal(kx2, (1000, in_features), dtype=jnp.float32)
    y_big = logistic_regression(x_big, weight, bias, block_rows=256)
    jax.block_until_ready(y_big)
    assert y_big.shape == (1000, 1)
    assert jnp.allclose(y_big, ref_fn(x_big), atol=1e-5, rtol=1e-5)

    print("KERNEL_OK")
</pallas_src>

<mosaic_0001>
module attributes {stable_mosaic.version = 11 : i64} {
  func.func @_logreg_kernel(%arg0: i32, %arg1: memref<8x30xf32, #tpu.memory_space<vmem>>, %arg2: memref<1x30xf32, #tpu.memory_space<vmem>>, %arg3: memref<1x1xf32, #tpu.memory_space<smem>>, %arg4: memref<1x8xf32, #tpu.memory_space<vmem>>) attributes {dimension_semantics = [#tpu.dimension_semantics<parallel>], iteration_bounds = array<i64: 1>, scalar_prefetch = 0 : i64, scratch_operands = 0 : i64, tpu.core_type = #tpu.core_type<tc>, window_params = [{transform_indices = @transform_0, window_bounds = array<i64: 8, 30>}, {pipeline_mode = #tpu.pipeline_mode<synchronous>, transform_indices = @transform_1, window_bounds = array<i64: 1, 30>}, {transform_indices = @transform_2, window_bounds = array<i64: 1, 1>}, {transform_indices = @transform_3, window_bounds = array<i64: 1, 8>}]} {
    %c0 = arith.constant 0 : index
    %c0_0 = arith.constant 0 : index
    %0 = vector.load %arg2[%c0, %c0_0] : memref<1x30xf32, #tpu.memory_space<vmem>>, vector<1x30xf32>
    %c0_1 = arith.constant 0 : index
    %c0_2 = arith.constant 0 : index
    %1 = vector.load %arg1[%c0_1, %c0_2] : memref<8x30xf32, #tpu.memory_space<vmem>>, vector<8x30xf32>
    %cst = arith.constant dense<0.000000e+00> : vector<1x8xf32>
    %2 = tpu.matmul %0, %1, %cst {dimension_numbers = #tpu.dot_dimension_numbers<[1], [1], [0], [0], [0, 0, 1, 0], [], []>, precision = #tpu.contract_precision<fp32>} : vector<1x30xf32>, vector<8x30xf32>, vector<1x8xf32> -> vector<1x8xf32>
    %c0_3 = arith.constant 0 : index
    %c0_4 = arith.constant 0 : index
    %3 = memref.load %arg3[%c0_3, %c0_4] : memref<1x1xf32, #tpu.memory_space<smem>>
    %4 = vector.broadcast %3 : f32 to vector<1x8xf32>
    %5 = arith.addf %2, %4 : vector<1x8xf32>
    %cst_5 = arith.constant 0.000000e+00 : f32
    %6 = vector.broadcast %cst_5 : f32 to vector<1x8xf32>
    %7 = arith.subf %6, %5 : vector<1x8xf32>
    %8 = math.exp %7 : vector<1x8xf32>
    %cst_6 = arith.constant 1.000000e+00 : f32
    %9 = vector.broadcast %cst_6 : f32 to vector<1x8xf32>
    %10 = arith.addf %9, %8 : vector<1x8xf32>
    %cst_7 = arith.constant 1.000000e+00 : f32
    %11 = vector.broadcast %cst_7 : f32 to vector<1x8xf32>
    %12 = arith.divf %11, %10 : vector<1x8xf32>
    %c0_8 = arith.constant 0 : index
    %c0_9 = arith.constant 0 : index
    %13 = vector.load %arg4[%c0_8, %c0_9] : memref<1x8xf32, #tpu.memory_space<vmem>>, vector<1x8xf32>
    tpu.vector_store %arg4[%c0_8, %c0_9], %12 {strides = array<i32>} : memref<1x8xf32, #tpu.memory_space<vmem>>, vector<1x8xf32>,
    return
  }
  func.func @transform_0(%arg0: i32) -> (i32, i32) {
    %c0_i32 = arith.constant 0 : i32
    %c0_i32_0 = arith.constant 0 : i32
    return %arg0, %c0_i32 : i32, i32
  }
  func.func @transform_1(%arg0: i32) -> (i32, i32) {
    %c0_i32 = arith.constant 0 : i32
    %c0_i32_0 = arith.constant 0 : i32
    %c0_i32_1 = arith.constant 0 : i32
    return %c0_i32, %c0_i32_0 : i32, i32
  }
  func.func @transform_2(%arg0: i32) -> (i32, i32) {
    %c0_i32 = arith.constant 0 : i32
    %c0_i32_0 = arith.constant 0 : i32
    %c0_i32_1 = arith.constant 0 : i32
    return %c0_i32, %c0_i32_0 : i32, i32
  }
  func.func @transform_3(%arg0: i32) -> (i32, i32) {
    %c0_i32 = arith.constant 0 : i32
    %c0_i32_0 = arith.constant 0 : i32
    return %c0_i32, %arg0 : i32, i32
  }
}

</mosaic_0001>

<bundles_post_ra>
// kernel: tpu_custom_call.1
= control target key start
LH: loop header
LB: loop body
LE: loop exit
PB: predicated region body
PF: predicated region fallthrough
CT: control target
= control target key end

     0   :  { %9 = vsyncpa [#allocation4], 0  ;;  %s676_s0 = inlined_call_operand.hbm [shape: f32[8,30], index: 0, kind: input, shape index: {}]   ;;  %s677_s1 = inlined_call_operand.vmem [shape: f32[1,30], index: 1, kind: input, shape index: {}]   ;;  %s678_s2 = inlined_call_operand.<no memory space> [shape: f32[1,1], index: 2, kind: input, shape index: {}]   ;;  %s679_s3 = inlined_call_operand.hbm [shape: f32[1,8], index: 3, kind: output, shape index: {}]  }
   0x1   :  { %10 = vsyncpa [#allocation5], 0  ;;  %s616_s12 = smov [#allocation3]   ;;  %s568_s16 = scalar_lea.hbm %s676_s0, 128 }
   0x2   :  { %s17_s13 = sshll.u32 %s616_s12, 4  ;;  %p569_p0 = scmp.ne.s32.totalorder %s676_s0, %s568_s16  ;;  %s18_s13 = int_to_ptr.vmem [resolvable:$true] %s17_s13 }
   0x3   :  { %p572_p1 = scmp.lt.u32.totalorder %s568_s16, %s676_s0 }
   0x5   :  { %p574_p2 = pnand %p572_p1, %p569_p0 }
   0x7   :  { %577 = shalt.err (!%p574_p2)
}
   0x8   :  { %s578_s21 = scalar_lea.vmem %s18_s13, 128  ;;  %p583_p4 = scmp.lt.s32.totalorder %s18_s13, %s18_s13 }
   0x9   :  { %p579_p3 = scmp.ne.s32.totalorder %s18_s13, %s578_s21  ;;  %p584_p5 = scmp.lt.s32.totalorder %s578_s21, %s578_s21 }
   0xb   :  { %p585_p6 = por %p584_p5, %p583_p4 }
   0xd   :  { %p586_p7 = pnand %p585_p6, %p579_p3 }
   0xf   :  { %589 = shalt.err (!%p586_p7)
}
  0x10   :  { %20 = dma.hbm_to_vmem [thread:$0]  %s676_s0, 128, %s18_s13, [#allocation4]  }
  0x11   :  { %612 = dma.done.wait [#allocation4], 128  }
  0x12   :  { %613 = vsyncadd [#allocation4], 4294967168  ;;  %v617_v0 = vmov 0.0   ;;  %vm618_vm0 = vmmov 0   ;;  %vm32_vm1 = vcmask 244736   ;;  %v29_v1 = vld [vmem:[#allocation3] sm:$0xff]  ;;  %v31_v17 = vstv %s678_s2 }
  0x13   :  { %535 = vmatprep.subr.mxu0 %v617_v0  ;;  %520 = vmatprep.subr.mxu1 %v617_v0  ;;  %v28_v2 = vld [vmem:[%s677_s1] sm:$0x1]  ;;  %v37_v3 = vsel %vm32_vm1, %v29_v1, 0  ;;  %s619_s26 = smov [#allocation6]   ;;  %vm491_vm2 = vcmask 57344  }
  0x14   :  { %537 = vmatprep.mubr.msk.f32.mxu0 %vm618_vm0, %v617_v0  ;;  %522 = vmatprep.mubr.msk.f32.mxu1 %vm618_vm0, %v617_v0  ;;  %v34_v4 = vsel %vm32_vm1, %v28_v2, 0  ;;  %v40_v5 = vand.u32 4294901760, %v37_v3  ;;  %s499_s27 = sshll.u32 %s619_s26, 4  ;;  %s500_s27 = int_to_ptr.vmem [resolvable:$true] %s499_s27 }
  0x15   :  { %v105_v6 = vand.u32 4294901760, %v34_v4  ;;  %s590_s28 = scalar_lea.vmem %s500_s27, 16  ;;  %s594_s29 = scalar_lea.vmem %s500_s27, 32 }
  0x16   :  { %v117_v7 = vsub.f32 %v37_v3, %v40_v5  ;;  %536 = vmatpush3.xpose.msra.mxu0 %v40_v5  ;;  %521 = vmatpush3.xpose.msra.mxu1 %v40_v5  ;;  %p591_p8 = scmp.ne.s32.totalorder %s500_s27, %s590_s28  ;;  %p595_p9 = scmp.lt.s32.totalorder %s500_s27, %s500_s27 }
  0x17   :  { %v106_v8 = vsub.f32 %v34_v4, %v105_v6  ;;  %525 = vmatprep.subr.mxu1 %v617_v0  ;;  %540 = vmatprep.subr.mxu0 %v617_v0  ;;  %p596_p10 = scmp.lt.s32.totalorder %s594_s29, %s590_s28 }
  0x18   :  { %v118_v10 = vand.u32 4294901760, %v117_v7 }
  0x19   :  { %v107_v9 = vand.u32 4294901760, %v106_v8  ;;  %p597_p11 = por %p596_p10, %p595_p9 }
  0x1a   :  { %v119_v12 = vsub.f32 %v117_v7, %v118_v10 }
  0x1b   :  { %538 = vmatmul.mubr.f32.vlgmr.msra.gmra.mrb[0].mxu0 %v107_v9  ;;  %v108_v11 = vsub.f32 %v106_v8, %v107_v9  ;;  %p598_p12 = pnand %p597_p11, %p591_p8 }
  0x1c   :  { %541 = vmatpush3.xpose.msra.mxu0 %v118_v10  ;;  %542 = vmatprep.mubr.msk.f32.mxu0 %vm618_vm0, %v617_v0  ;;  %v120_v14 = vand.u32 4294901760, %v119_v12 }
  0x1d   :  { %v109_v13 = vand.u32 4294901760, %v108_v11  ;;  %545 = vmatprep.subr.mxu0 %v617_v0 }
  0x1f   :  { %523 = vmatmul.mubr.f32.vlgmr.msra.gmra.mrb[0].mxu1 %v109_v13 }
  0x20   :  { %526 = vmatpush3.xpose.msra.mxu1 %v120_v14  ;;  %527 = vmatprep.mubr.msk.f32.mxu1 %vm618_vm0, %v617_v0 }
  0x21   :  { %530 = vmatprep.subr.mxu1 %v617_v0 }
  0x23   :  { %543 = vmatmul.mubr.f32.vlgmr.msra.gmra.mrb[0].mxu0 %v105_v6 }
  0x24   :  { %546 = vmatpush3.xpose.msra.mxu0 %v40_v5  ;;  %547 = vmatprep.mubr.msk.f32.mxu0 %vm618_vm0, %v617_v0 }
  0x27   :  { %528 = vmatmul.mubr.f32.vlgmr.msra.gmra.mrb[0].mxu1 %v105_v6 }
  0x28   :  { %531 = vmatpush3.xpose.msra.mxu1 %v117_v7  ;;  %532 = vmatprep.mubr.msk.f32.mxu1 %vm618_vm0, %v617_v0 }
  0x2b   :  { %548 = vmatmul.mubr.f32.vlgmr.msra.gmra.mrb[0].mxu0 %v105_v6 }
  0x2f   :  { %533 = vmatmul.mubr.f32.vlgmr.msra.gmra.mrb[0].mxu1 %v106_v8 }
  0xfe   :  { %v481_v15 = vpop.f32.mrb[0].mxu0 }
  0xff   :  { %v549_v16 = vpop.f32.mrb[1].mxu0 }
 0x102   :  { %v261_v18 = vpop.f32.mrb[0].mxu1 }
 0x103   :  { %v550_v19 = vadd.f32 %v261_v18, %v31_v17  ;;  %v534_v20 = vpop.f32.mrb[1].mxu1 }
 0x105   :  { %v551_v21 = vadd.f32 %v550_v19, %v481_v15 }
 0x107   :  { %v485_v22 = vsub.f32 0.0, %v551_v21 }
 0x109   :  { %v486_v23 = vmul.f32 1.442695, %v485_v22 }
 0x10b   :  { %564 = vpow2.f32 %v486_v23 }
 0x115   :  { %v565_v24 = vpop.eup %564 }
 0x116   :  { %v488_v25 = vadd.f32 1.0, %v565_v24 }
 0x118   :  { %566 = vrcp.f32 %v488_v25 }
 0x122   :  { %v567_v26 = vpop.eup %566 }
 0x123   :  { %492 = vst.msk [vmem:[#allocation6] sm:$0x1] %vm491_vm2, %v567_v26 }
 0x124   :  { %601 = shalt.err (!%p598_p12)
}
 0x125   :  { %s602_s4 = scalar_lea.hbm %s679_s3, 16 }
 0x126   :  { %p603_p13 = scmp.ne.s32.totalorder %s679_s3, %s602_s4  ;;  %p606_p0 = scmp.lt.u32.totalorder %s602_s4, %s679_s3 }
 0x128   :  { %p608_p1 = pnand %p606_p0, %p603_p13 }
 0x12a   :  { %611 = shalt.err (!%p608_p1)
}
 0x12b   :  { %502 = dma.vmem_to_hbm [thread:$0]  %s500_s27, 16, %s679_s3, [#allocation5]  }
 0x12c   :  { %614 = dma.done.wait [#allocation5], 16  }
 0x12d   :  { %615 = vsyncadd [#allocation5], 4294967280 }
 0x12e   :  { %506 = vsyncpa [#allocation4], 1 }
 0x12f   :  { %507 = vsyncpa [#allocation5], 1 }

</bundles_post_ra>
